<compile_context>
chip_gen: v6e
topology: v6e:2x2x1
jax: 0.10.0
libtpu: 0.0.40
codegen_flags: <defaults>
</compile_context>

<pallas_src>
import functools

import jax
import jax.numpy as jnp
from jax.experimental import pallas as pl
from jax.experimental.pallas import tpu as pltpu


def _round_up(v, m):
    return (v + m - 1) // m * m


def _mlp_kernel(xt_ref, w_ref, b_ref, o_ref, *, d_in, h1p, h2p):
    # Static, tile-aligned row offsets into the packed buffers.
    off_w1t = 0
    off_w2t = h1p
    off_w3 = h1p + h2p

    xt = xt_ref[...]                                        # (d_in, TB) bf16

    # Layer 1: h1^T = W1^T @ x^T + b1, ReLU  (MXU bf16, f32 accumulation).
    w1t = w_ref[off_w1t:off_w1t + h1p, 0:d_in]              # (H1p, d_in) bf16
    b1 = b_ref[0:h1p, 0:1]                                  # (H1p, 1) f32
    h1t = jnp.dot(w1t, xt, preferred_element_type=jnp.float32) + b1
    h1t = jnp.maximum(h1t, 0.0).astype(jnp.bfloat16)        # (H1p, TB)

    # Layer 2: h2^T = W2^T @ h1^T + b2, ReLU.
    w2t = w_ref[off_w2t:off_w2t + h2p, 0:h1p]               # (H2p, H1p) bf16
    b2 = b_ref[h1p:h1p + h2p, 0:1]                          # (H2p, 1) f32
    h2t = jnp.dot(w2t, h1t, preferred_element_type=jnp.float32) + b2
    h2t = jnp.maximum(h2t, 0.0).astype(jnp.bfloat16)        # (H2p, TB)

    # Layer 3: output width 1. Use a 16-row MXU slab (row 0 = w3, rest zero)
    # so the result is natively lane-dense; keep row 0. No XLU reduce, no
    # sublane->lane relayout.
    w3s = w_ref[off_w3:off_w3 + 16, 0:h2p]                  # (16, H2p) bf16
    b3 = b_ref[h1p + h2p:h1p + h2p + 1, 0:1]                # (1, 1) f32
    y = jnp.dot(w3s, h2t, preferred_element_type=jnp.float32)   # (16, TB)
    # NOTE: padded batch lanes also receive b3; they are sliced off in the
    # wrapper, so this is harmless.
    o_ref[...] = (y[0:1, :] + b3).astype(o_ref.dtype)


def pack_params(params):
    """Pack weights (bf16, transposed) and biases (f32) into aligned buffers.

    Weight buffer (bf16), columns = max(d_in, H1p, H2p), 16-aligned row
    offsets (bf16 sublane tiling):
      rows [0, H1p)            : W1^T  (hidden1 x input_size), zero-padded
      rows [H1p, H1p+H2p)      : W2^T  (hidden2 x hidden1), zero-padded
      rows [H1p+H2p, +16)      : w3 as row 0 of a 16-row slab, rest zero
    Bias buffer (f32, width 128, column 0 used):
      rows [0, H1p)            : b1
      rows [H1p, H1p+H2p)      : b2
      row  H1p+H2p             : b3
    Zero padding is exact for the forward math (ReLU(0)=0, padded weight
    rows/cols and bias entries are zero).
    """
    w1, b1 = params["w1"], params["b1"]
    w2, b2 = params["w2"], params["b2"]
    w3, b3 = params["w3"], params["b3"]

    d_in, h1 = w1.shape
    h2 = w2.shape[1]
    h1p = _round_up(max(h1, 1), 128)
    h2p = _round_up(max(h2, 1), 128)

    wcols = max(d_in, h1p, h2p)
    wrows = h1p + h2p + 16
    wbuf = jnp.zeros((wrows, wcols), jnp.bfloat16)
    wbuf = wbuf.at[0:h1, 0:d_in].set(w1.T.astype(jnp.bfloat16))
    wbuf = wbuf.at[h1p:h1p + h2, 0:h1].set(w2.T.astype(jnp.bfloat16))
    wbuf = wbuf.at[h1p + h2p:h1p + h2p + 1, 0:h2].set(
        w3.reshape(1, h2).astype(jnp.bfloat16))

    brows = h1p + h2p + 8
    bbuf = jnp.zeros((brows, 128), jnp.float32)
    bbuf = bbuf.at[0:h1, 0].set(b1.reshape(h1).astype(jnp.float32))
    bbuf = bbuf.at[h1p:h1p + h2, 0].set(b2.reshape(h2).astype(jnp.float32))
    bbuf = bbuf.at[h1p + h2p, 0].set(b3.reshape(()).astype(jnp.float32))

    meta = dict(d_in=d_in, h1=h1, h2=h2, h1p=h1p, h2p=h2p)
    return (wbuf, bbuf), meta


def _choose_tb(batch):
    """Pick the batch tile: multiple of 128, <= 2048, minimal padding waste,
    and >= 2 grid steps once the padded batch reaches 256 rows so the
    "parallel" grid axis can be sharded across both v7x TensorCores."""
    b128 = _round_up(max(batch, 1), 128)
    if b128 <= 256:
        return 128
    cap = max(128, min(2048, (b128 // 2) // 128 * 128))
    best_tb, best_key = None, None
    for tb in range(128, cap + 1, 128):
        b_pad = _round_up(b128, tb)
        # Fewest grid steps, then least padding, then largest tile.
        key = (b_pad // tb, b_pad - b128, -tb)
        if best_key is None or key < best_key:
            best_tb, best_key = tb, key
    return best_tb


def metric_nn_forward(x, packed, meta):
    """Fused metricNN forward. x: (B, input_size) -> (B, 1) float32."""
    B, d_in = x.shape
    assert d_in == meta["d_in"]
    h1p, h2p = meta["h1p"], meta["h2p"]
    wbuf, bbuf = packed

    tb = _choose_tb(B)
    b_pad = _round_up(max(B, 1), tb)

    # Transposed, bf16, batch-padded input: (d_in, B_pad), batch on lanes.
    # Features are NOT padded; only the batch dim is, and padded lanes are
    # sliced off below (their outputs are irrelevant).
    xt = jnp.zeros((d_in, b_pad), jnp.bfloat16)
    xt = xt.at[:, :B].set(x.astype(jnp.bfloat16).T)

    kernel = functools.partial(_mlp_kernel, d_in=d_in, h1p=h1p, h2p=h2p)

    h1, h2 = meta["h1"], meta["h2"]
    flops = 2 * b_pad * (d_in * h1 + h1 * h2 + h2)
    bytes_accessed = (xt.size * 2 + wbuf.size * 2 + bbuf.size * 4 + b_pad * 4)

    out = pl.pallas_call(
        kernel,
        out_shape=jax.ShapeDtypeStruct((1, b_pad), jnp.float32),
        grid=(b_pad // tb,),
        in_specs=[
            pl.BlockSpec((d_in, tb), lambda i: (0, i)),      # x^T: batch-tiled
            pl.BlockSpec(wbuf.shape, lambda i: (0, 0)),      # weights: pinned
            pl.BlockSpec(bbuf.shape, lambda i: (0, 0)),      # biases: pinned
        ],
        out_specs=pl.BlockSpec((1, tb), lambda i: (0, i)),   # lane-dense out
        compiler_params=pltpu.CompilerParams(
            dimension_semantics=("parallel",)),
        cost_estimate=pl.CostEstimate(
            flops=flops, transcendentals=0, bytes_accessed=bytes_accessed),
    )(xt, wbuf, bbuf)

    return out[0, :B].reshape(B, 1)


def init_params(key, input_size, hidden_size1, hidden_size2):
    """Deterministic init mimicking nn.Linear's uniform(-1/sqrt(fan_in), ...)."""
    ks = jax.random.split(key, 6)

    def lin(kw, kb, fan_in, fan_out):
        bound = 1.0 / jnp.sqrt(jnp.float32(fan_in))
        w = jax.random.uniform(kw, (fan_in, fan_out), jnp.float32, -bound, bound)
        b = jax.random.uniform(kb, (1, fan_out), jnp.float32, -bound, bound)
        return w, b

    w1, b1 = lin(ks[0], ks[1], input_size, hidden_size1)
    w2, b2 = lin(ks[2], ks[3], hidden_size1, hidden_size2)
    w3, b3 = lin(ks[4], ks[5], hidden_size2, 1)
    return {"w1": w1, "b1": b1, "w2": w2, "b2": b2, "w3": w3, "b3": b3}


def metric_nn_reference(x, p):
    """Pure-JAX f32 reference for correctness checking."""
    h1 = jnp.maximum(x @ p["w1"] + p["b1"], 0.0)
    h2 = jnp.maximum(h1 @ p["w2"] + p["b2"], 0.0)
    return h2 @ p["w3"] + p["b3"]


if __name__ == "__main__":
    key = jax.random.PRNGKey(0)
    k_x, k_p = jax.random.split(key)

    # Small shapes consistent with the module: batch=8, input_size=16,
    # hidden_size1=32, hidden_size2=32.
    batch, input_size, hidden1, hidden2 = 8, 16, 32, 32

    x = jax.random.normal(k_x, (batch, input_size), dtype=jnp.float32)
    params = init_params(k_p, input_size, hidden1, hidden2)

    packed, meta = pack_params(params)
    y = metric_nn_forward(x, packed, meta)
    y = jax.block_until_ready(y)

    y_ref = metric_nn_reference(x, params)
    assert y.shape == (batch, 1)
    # bf16 MXU operands -> looser tolerance than the f32 reference.
    assert jnp.allclose(y, y_ref, atol=5e-2, rtol=5e-2), float(
        jnp.max(jnp.abs(y - y_ref)))

    print("KERNEL_OK")
</pallas_src>

<mosaic_0001>
module attributes {stable_mosaic.version = 11 : i64} {
  func.func @_mlp_kernel(%arg0: i32, %arg1: memref<16x128xbf16, #tpu.memory_space<vmem>>, %arg2: memref<272x128xbf16, #tpu.memory_space<vmem>>, %arg3: memref<264x128xf32, #tpu.memory_space<vmem>>, %arg4: memref<1x128xf32, #tpu.memory_space<vmem>>) attributes {dimension_semantics = [#tpu.dimension_semantics<parallel>], iteration_bounds = array<i64: 1>, scalar_prefetch = 0 : i64, scratch_operands = 0 : i64, tpu.core_type = #tpu.core_type<tc>, window_params = [{transform_indices = @transform_0, window_bounds = array<i64: 16, 128>}, {pipeline_mode = #tpu.pipeline_mode<synchronous>, transform_indices = @transform_1, window_bounds = array<i64: 272, 128>}, {pipeline_mode = #tpu.pipeline_mode<synchronous>, transform_indices = @transform_2, window_bounds = array<i64: 264, 128>}, {transform_indices = @transform_3, window_bounds = array<i64: 1, 128>}]} {
    %c0 = arith.constant 0 : index
    %c0_0 = arith.constant 0 : index
    %0 = vector.load %arg1[%c0, %c0_0] : memref<16x128xbf16, #tpu.memory_space<vmem>>, vector<16x128xbf16>
    %c0_1 = arith.constant 0 : index
    %c0_2 = arith.constant 0 : index
    %1 = vector.load %arg2[%c0_1, %c0_2] : memref<272x128xbf16, #tpu.memory_space<vmem>>, vector<128x16xbf16>
    %c0_3 = arith.constant 0 : index
    %c0_4 = arith.constant 0 : index
    %2 = vector.load %arg3[%c0_3, %c0_4] : memref<264x128xf32, #tpu.memory_space<vmem>>, vector<128x1xf32>
    %cst = arith.constant dense<0.000000e+00> : vector<128x128xf32>
    %3 = tpu.matmul %1, %0, %cst {dimension_numbers = #tpu.dot_dimension_numbers<[1], [0], [0], [1], [0, 0, 1, 1], [], []>} : vector<128x16xbf16>, vector<16x128xbf16>, vector<128x128xf32> -> vector<128x128xf32>
    %4 = vector.broadcast %2 : vector<128x1xf32> to vector<128x128xf32>
    %5 = arith.addf %3, %4 : vector<128x128xf32>
    %cst_5 = arith.constant 0.000000e+00 : f32
    %6 = vector.broadcast %cst_5 : f32 to vector<128x128xf32>
    %7 = arith.maximumf %5, %6 : vector<128x128xf32>
    %8 = arith.truncf %7 : vector<128x128xf32> to vector<128x128xbf16>
    %c128 = arith.constant 128 : index
    %c0_6 = arith.constant 0 : index
    %9 = vector.load %arg2[%c128, %c0_6] : memref<272x128xbf16, #tpu.memory_space<vmem>>, vector<128x128xbf16>
    %c128_7 = arith.constant 128 : index
    %c0_8 = arith.constant 0 : index
    %10 = vector.load %arg3[%c128_7, %c0_8] : memref<264x128xf32, #tpu.memory_space<vmem>>, vector<128x1xf32>
    %cst_9 = arith.constant dense<0.000000e+00> : vector<128x128xf32>
    %11 = tpu.matmul %9, %8, %cst_9 {dimension_numbers = #tpu.dot_dimension_numbers<[1], [0], [0], [1], [0, 0, 1, 1], [], []>} : vector<128x128xbf16>, vector<128x128xbf16>, vector<128x128xf32> -> vector<128x128xf32>
    %12 = vector.broadcast %10 : vector<128x1xf32> to vector<128x128xf32>
    %13 = arith.addf %11, %12 : vector<128x128xf32>
    %cst_10 = arith.constant 0.000000e+00 : f32
    %14 = vector.broadcast %cst_10 : f32 to vector<128x128xf32>
    %15 = arith.maximumf %13, %14 : vector<128x128xf32>
    %16 = arith.truncf %15 : vector<128x128xf32> to vector<128x128xbf16>
    %c256 = arith.constant 256 : index
    %c0_11 = arith.constant 0 : index
    %17 = vector.load %arg2[%c256, %c0_11] : memref<272x128xbf16, #tpu.memory_space<vmem>>, vector<16x128xbf16>
    %c256_12 = arith.constant 256 : index
    %c0_13 = arith.constant 0 : index
    %18 = vector.load %arg3[%c256_12, %c0_13] : memref<264x128xf32, #tpu.memory_space<vmem>>, vector<1x1xf32>
    %cst_14 = arith.constant dense<0.000000e+00> : vector<16x128xf32>
    %19 = tpu.matmul %17, %16, %cst_14 {dimension_numbers = #tpu.dot_dimension_numbers<[1], [0], [0], [1], [0, 0, 1, 1], [], []>} : vector<16x128xbf16>, vector<128x128xbf16>, vector<16x128xf32> -> vector<16x128xf32>
    %20 = vector.extract_strided_slice %19 {offsets = [0, 0], sizes = [1, 128], strides = [1, 1]} : vector<16x128xf32> to vector<1x128xf32>
    %21 = vector.broadcast %18 : vector<1x1xf32> to vector<1x128xf32>
    %22 = arith.addf %20, %21 : vector<1x128xf32>
    %c0_15 = arith.constant 0 : index
    %c0_16 = arith.constant 0 : index
    %23 = vector.load %arg4[%c0_15, %c0_16] : memref<1x128xf32, #tpu.memory_space<vmem>>, vector<1x128xf32>
    tpu.vector_store %arg4[%c0_15, %c0_16], %22 {strides = array<i32>} : memref<1x128xf32, #tpu.memory_space<vmem>>, vector<1x128xf32>,
    return
  }
  func.func @transform_0(%arg0: i32) -> (i32, i32) {
    %c0_i32 = arith.constant 0 : i32
    %c0_i32_0 = arith.constant 0 : i32
    return %c0_i32, %arg0 : i32, i32
  }
  func.func @transform_1(%arg0: i32) -> (i32, i32) {
    %c0_i32 = arith.constant 0 : i32
    %c0_i32_0 = arith.constant 0 : i32
    %c0_i32_1 = arith.constant 0 : i32
    return %c0_i32, %c0_i32_0 : i32, i32
  }
  func.func @transform_2(%arg0: i32) -> (i32, i32) {
    %c0_i32 = arith.constant 0 : i32
    %c0_i32_0 = arith.constant 0 : i32
    %c0_i32_1 = arith.constant 0 : i32
    return %c0_i32, %c0_i32_0 : i32, i32
  }
  func.func @transform_3(%arg0: i32) -> (i32, i32) {
    %c0_i32 = arith.constant 0 : i32
    %c0_i32_0 = arith.constant 0 : i32
    return %c0_i32, %arg0 : i32, i32
  }
}

</mosaic_0001>

<bundles_post_ra>
// kernel: tpu_custom_call.1
= control target key start
LH: loop header
LB: loop body
LE: loop exit
PB: predicated region body
PF: predicated region fallthrough
CT: control target
= control target key end

     0   :  { %8 = vsyncpa [#allocation3], 0  ;;  %s1041_s0 = inlined_call_operand.hbm [shape: bf16[16,128], index: 0, kind: input, shape index: {}]   ;;  %s1042_s1 = inlined_call_operand.hbm [shape: bf16[272,128], index: 1, kind: input, shape index: {}]   ;;  %s1043_s2 = inlined_call_operand.hbm [shape: f32[264,128], index: 2, kind: input, shape index: {}]   ;;  %s1044_s3 = inlined_call_operand.hbm [shape: f32[1,128], index: 3, kind: output, shape index: {}]  }
   0x1   :  { %9 = vsyncpa [#allocation6], 0 }
   0x2   :  { %10 = vsyncpa [#allocation4], 0  ;;  %s963_s12 = smov [#allocation5]   ;;  %s964_s14 = smov [#allocation2]  }
   0x3   :  { %s28_s13 = sshll.u32 %s963_s12, 4  ;;  %s16_s15 = sshll.u32 %s964_s14, 4  ;;  %s29_s13 = int_to_ptr.vmem [resolvable:$true] %s28_s13  ;;  %s17_s15 = int_to_ptr.vmem [resolvable:$true] %s16_s15 }
   0x4   :  { %s885_s16 = scalar_lea.vmem %s29_s13, 2176  ;;  %p890_p1 = scmp.lt.s32.totalorder %s29_s13, %s29_s13 }
   0x5   :  { %p886_p0 = scmp.ne.s32.totalorder %s29_s13, %s885_s16  ;;  %p891_p2 = scmp.lt.s32.totalorder %s885_s16, %s885_s16 }
   0x7   :  { %p892_p3 = por %p891_p2, %p890_p1 }
   0x9   :  { %p893_p4 = pnand %p892_p3, %p886_p0 }
   0xb   :  { %896 = shalt.err (!%p893_p4)
}
   0xc   :  { %s965_s17 = smov 64   ;;  %s966_s18 = smov 4  }
   0xd   :  { %34 = dma.hbm_to_vmem [thread:$0]  %s1042_s1, 2176, %s29_s13, [#allocation6], %s965_s17, %s965_s17, %s966_s18  }
   0xe   :  { %s905_s21 = scalar_lea.vmem %s17_s15, 128  ;;  %p910_p6 = scmp.lt.s32.totalorder %s17_s15, %s17_s15 }
   0xf   :  { %p906_p5 = scmp.ne.s32.totalorder %s17_s15, %s905_s21  ;;  %p911_p7 = scmp.lt.s32.totalorder %s905_s21, %s905_s21 }
  0x11   :  { %p912_p8 = por %p911_p7, %p910_p6 }
  0x13   :  { %p913_p9 = pnand %p912_p8, %p906_p5 }
  0x15   :  { %916 = shalt.err (!%p913_p9)
}
  0x16   :  { %22 = dma.hbm_to_vmem [thread:$0]  %s1041_s0, 128, %s17_s15, [#allocation3], %s965_s17, %s965_s17, %s966_s18  }
  0x17   :  { %s967_s24 = smov [#allocation7]  }
  0x18   :  { %s40_s25 = sshll.u32 %s967_s24, 4  ;;  %s41_s25 = int_to_ptr.vmem [resolvable:$true] %s40_s25 }
  0x19   :  { %s925_s26 = scalar_lea.vmem %s41_s25, 4224  ;;  %p930_p11 = scmp.lt.s32.totalorder %s41_s25, %s41_s25 }
  0x1a   :  { %p926_p10 = scmp.ne.s32.totalorder %s41_s25, %s925_s26  ;;  %p931_p12 = scmp.lt.s32.totalorder %s925_s26, %s925_s26 }
  0x1c   :  { %p932_p13 = por %p931_p12, %p930_p11 }
  0x1e   :  { %p933_p0 = pnand %p932_p13, %p926_p10 }
  0x20   :  { %936 = shalt.err (!%p933_p0)
}
  0x21   :  { %s968_s1 = smov 128   ;;  %s969_s27 = smov 8  }
  0x22   :  { %46 = dma.hbm_to_vmem [thread:$0]  %s1043_s2, 4224, %s41_s25, [#allocation6], %s968_s1, %s968_s1, %s969_s27  }
  0x23   :  { %957 = dma.done.wait [#allocation3], 128  }
  0x24   :  { %958 = vsyncadd [#allocation3], 4294967168 }
  0x25   :  { %959 = dma.done.wait [#allocation6], 6400  }
  0x26   :  { %960 = vsyncadd [#allocation6], 4294960896  ;;  %v970_v0 = vmov 0   ;;  %v859_v1 = vld [vmem:[#allocation2] sm:$0xff]   ;;  %vm217_vm0 = vcmask 130048   ;;  %v860_v2 = vld [vmem:[#allocation5] sm:$0xff]  }
  0x27   :  { %857 = vset.pattern.permute.xlu0 %v970_v0  ;;  %858 = vset.pattern.permute.xlu1 %v970_v0  ;;  %v861_v3 = vld [vmem:[#allocation5 + $0x8] sm:$0xff]   ;;  %v862_v4 = vld [vmem:[#allocation5 + $0x10] sm:$0xff]   ;;  %v89_v5 = vld [vmem:[#allocation7 + $0x70] sm:$0xff]  ;;  %vm972_vm1 = vmmov 0   ;;  %s973_s0 = smov [#allocation8]  }
  0x28   :  { %776 = vmatprep.subr.bf16.mxu0 %v859_v1  ;;  %778 = vmatprep.mubr.msk.bf16.mxu0 %vm217_vm0, %v860_v2  ;;  %v87_v6 = vld [vmem:[#allocation7 + $0x60] sm:$0xff]  ;;  %v863_v7 = vld [vmem:[#allocation5 + $0x18] sm:$0xff]   ;;  %v864_v8 = vld [vmem:[#allocation5 + $0x20] sm:$0xff]   ;;  %s706_s2 = sshll.u32 %s973_s0, 4  ;;  %s707_s2 = int_to_ptr.vmem [resolvable:$true] %s706_s2 }
  0x29   :  { %777 = vmatpush3.bf16.msra.mxu0 %v859_v1  ;;  %163 = vperm.xlu0 %857, %v89_v5   ;;  %v90_v9 = vld [vmem:[#allocation7 + $0x78] sm:$0xff]  ;;  %v88_v10 = vld [vmem:[#allocation7 + $0x68] sm:$0xff]  ;;  %v85_v11 = vld [vmem:[#allocation7 + $0x50] sm:$0xff]  ;;  %s937_s30 = scalar_lea.vmem %s707_s2, 16  ;;  %s941_s4 = scalar_lea.vmem %s707_s2, 32 }
  0x2a   :  { %153 = vperm.xlu1 %858, %v87_v6   ;;  %v86_v12 = vld [vmem:[#allocation7 + $0x58] sm:$0xff]  ;;  %v865_v13 = vld [vmem:[#allocation5 + $0x28] sm:$0xff]   ;;  %v866_v14 = vld [vmem:[#allocation5 + $0x30] sm:$0xff]   ;;  %p938_p1 = scmp.ne.s32.totalorder %s707_s2, %s937_s30  ;;  %p942_p2 = scmp.lt.s32.totalorder %s707_s2, %s707_s2 }
  0x2b   :  { %v83_v15 = vld [vmem:[#allocation7 + $0x40] sm:$0xff]  ;;  %v84_v16 = vld [vmem:[#allocation7 + $0x48] sm:$0xff]  ;;  %v81_v17 = vld [vmem:[#allocation7 + $0x30] sm:$0xff]  ;;  %p943_p3 = scmp.lt.s32.totalorder %s941_s4, %s937_s30 }
  0x2c   :  { %779 = vmatmul.mubr.msk.bf16.vlgmr.msra.gmra.mxu0 %vm217_vm0, %v861_v3  ;;  %v82_v18 = vld [vmem:[#allocation7 + $0x38] sm:$0xff]  ;;  %v867_v19 = vld [vmem:[#allocation5 + $0x38] sm:$0xff]   ;;  %v79_v20 = vld [vmem:[#allocation7 + $0x20] sm:$0xff] }
  0x2d   :  { %782 = vmatprep.mubr.msk.bf16.mxu0 %vm217_vm0, %v862_v4  ;;  %168 = vperm.xlu0 %857, %v90_v9   ;;  %v80_v21 = vld [vmem:[#allocation7 + $0x28] sm:$0xff]  ;;  %v77_v22 = vld [vmem:[#allocation7 + $0x10] sm:$0xff]  ;;  %v78_v23 = vld [vmem:[#allocation7 + $0x18] sm:$0xff]  ;;  %p944_p4 = por %p943_p3, %p942_p2 }
  0x2e   :  { %158 = vperm.xlu1 %858, %v88_v10   ;;  %v75_v24 = vld [vmem:[#allocation7] sm:$0xff]  ;;  %v76_v25 = vld [vmem:[#allocation7 + $0x8] sm:$0xff]  ;;  %v393_v26 = vld [vmem:[#allocation7 + $0xf0] sm:$0xff] }
  0x2f   :  { %v394_v27 = vld [vmem:[#allocation7 + $0xf8] sm:$0xff]  ;;  %v391_v28 = vld [vmem:[#allocation7 + $0xe0] sm:$0xff]  ;;  %v392_v29 = vld [vmem:[#allocation7 + $0xe8] sm:$0xff]  ;;  %p945_p5 = pnand %p944_p4, %p938_p1 }
  0x30   :  { %v389_v30 = vld [vmem:[#allocation7 + $0xd0] sm:$0xff]  ;;  %v390_v31 = vld [vmem:[#allocation7 + $0xd8] sm:$0xff]  ;;  %v387_v32 = vld [vmem:[#allocation7 + $0xc0] sm:$0xff] }
  0x31   :  { %143 = vperm.xlu0 %857, %v85_v11   ;;  %v388_v33 = vld [vmem:[#allocation7 + $0xc8] sm:$0xff]  ;;  %v385_v34 = vld [vmem:[#allocation7 + $0xb0] sm:$0xff]  ;;  %v386_v35 = vld [vmem:[#allocation7 + $0xb8] sm:$0xff] }
  0x32   :  { %148 = vperm.xlu1 %858, %v86_v12   ;;  %v383_v36 = vld [vmem:[#allocation7 + $0xa0] sm:$0xff]  ;;  %v384_v37 = vld [vmem:[#allocation7 + $0xa8] sm:$0xff]  ;;  %v381_v38 = vld [vmem:[#allocation7 + $0x90] sm:$0xff] }
  0x33   :  { %v382_v39 = vld [vmem:[#allocation7 + $0x98] sm:$0xff]  ;;  %v379_v40 = vld [vmem:[#allocation7 + $0x80] sm:$0xff]  ;;  %v380_v41 = vld [vmem:[#allocation7 + $0x88] sm:$0xff] }
  0x34   :  { %783 = vmatmul.mubr.msk.bf16.gmra.mxu0 %vm217_vm0, %v863_v7  ;;  %v646_v42 = vld [vmem:[#allocation7 + $0x100] sm:$0x1]  ;;  %v868_v43 = vld [vmem:[#allocation5 + $0x40] sm:$0xff]  }
  0x35   :  { %786 = vmatprep.mubr.msk.bf16.mxu0 %vm217_vm0, %v864_v8  ;;  %133 = vperm.xlu0 %857, %v83_v15  }
  0x36   :  { %138 = vperm.xlu1 %858, %v84_v16   ;;  %810 = vmatprep.mubr.bf16.mxu1 %v868_v43 }
  0x39   :  { %123 = vperm.xlu0 %857, %v81_v17  }
  0x3a   :  { %128 = vperm.xlu1 %858, %v82_v18  }
  0x3c   :  { %787 = vmatmul.mubr.msk.bf16.gmra.mxu0 %vm217_vm0, %v865_v13 }
  0x3d   :  { %790 = vmatprep.mubr.msk.bf16.mxu0 %vm217_vm0, %v866_v14  ;;  %113 = vperm.xlu0 %857, %v79_v20  }
  0x3e   :  { %118 = vperm.xlu1 %858, %v80_v21  }
  0x41   :  { %103 = vperm.xlu0 %857, %v77_v22  }
  0x42   :  { %108 = vperm.xlu1 %858, %v78_v23  }
  0x44   :  { %791 = vmatmul.mubr.msk.bf16.gmra.mxu0 %vm217_vm0, %v867_v19 }
  0x45   :  { %93 = vperm.xlu0 %857, %v75_v24  }
  0x46   :  { %98 = vperm.xlu1 %858, %v76_v25  }
  0x49   :  { %467 = vperm.xlu0 %857, %v393_v26  }
  0x4a   :  { %472 = vperm.xlu1 %858, %v394_v27  }
  0x4d   :  { %457 = vperm.xlu0 %857, %v391_v28  }
  0x4e   :  { %462 = vperm.xlu1 %858, %v392_v29  }
  0x51   :  { %447 = vperm.xlu0 %857, %v389_v30  }
  0x52   :  { %452 = vperm.xlu1 %858, %v390_v31  }
  0x55   :  { %437 = vperm.xlu0 %857, %v387_v32  }
  0x56   :  { %442 = vperm.xlu1 %858, %v388_v33  }
  0x59   :  { %427 = vperm.xlu0 %857, %v385_v34  }
  0x5a   :  { %432 = vperm.xlu1 %858, %v386_v35  }
  0x5d   :  { %417 = vperm.xlu0 %857, %v383_v36  }
  0x5e   :  { %422 = vperm.xlu1 %858, %v384_v37  }
  0x61   :  { %407 = vperm.xlu0 %857, %v381_v38  }
  0x62   :  { %412 = vperm.xlu1 %858, %v382_v39  }
  0x65   :  { %397 = vperm.xlu0 %857, %v379_v40  }
  0x66   :  { %402 = vperm.xlu1 %858, %v380_v41  }
  0x69   :  { %695 = vperm.xlu0 %857, %v646_v42  }
  0xa4   :  { %v164_v50 = vpop.permute.xlu0 %163 }
  0xa5   :  { %v154_v48 = vpop.permute.xlu1 %153 }
  0xa8   :  { %v169_v55 = vpop.permute.xlu0 %168 }
  0xa9   :  { %v159_v53 = vpop.permute.xlu1 %158 }
  0xac   :  { %v144_v60 = vpop.permute.xlu0 %143 }
  0xad   :  { %v149_v58 = vpop.permute.xlu1 %148 }
  0xb0   :  { %v134_v2 = vpop.permute.xlu0 %133 }
  0xb1   :  { %v139_v63 = vpop.permute.xlu1 %138 }
  0xb4   :  { %v124_v16 = vpop.permute.xlu0 %123 }
  0xb5   :  { %v129_v11 = vpop.permute.xlu1 %128 }
  0xb8   :  { %v114_v26 = vpop.permute.xlu0 %113 }
  0xb9   :  { %v119_v22 = vpop.permute.xlu1 %118 }
  0xbc   :  { %v104_v35 = vpop.permute.xlu0 %103 }
  0xbd   :  { %v109_v32 = vpop.permute.xlu1 %108 }
  0xc1   :  { %v99_v41 = vpop.permute.xlu1 %98 }
  0xec   :  { %v1011_v44 = vpop.f32.mrf.mxu0 }
  0xed   :  { %v285_v39 = vadd.f32 %v1011_v44, %v104_v35  ;;  %v869_v44 = vld [vmem:[#allocation5 + $0x48] sm:$0xff]  }
  0xee   :  { %v1013_v45 = vpop.f32.mrf.mxu0 }
  0xf0   :  { %v781_v46 = vpop.f32.mrf.mxu0 }
  0xf1   :  { %v288_v36 = vadd.f32 %v781_v46, %v109_v32 }
  0xf2   :  { %v1015_v47 = vpop.f32.mrf.mxu0 }
  0xf3   :  { %v342_v42 = vmax.f32 %v288_v36, 0.0  ;;  %v280_v43 = vadd.f32 %v1015_v47, %v99_v41  ;;  %v871_v47 = vld [vmem:[#allocation5 + $0x58] sm:$0xff]  }
  0xf4   :  { %v784_v49 = vpop.f32.mrf.mxu0 }
  0xf5   :  { %v301_v27 = vadd.f32 %v784_v49, %v124_v16  ;;  %v94_v49 = vpop.permute.xlu0 %93  ;;  %v340_v46 = vmax.f32 %v280_v43, 0.0 }
  0xf6   :  { %v292_v51 = vpop.f32.mrf.mxu0 }
  0xf7   :  { %v345_v33 = vmax.f32 %v301_v27, 0.0  ;;  %v293_v34 = vadd.f32 %v292_v51, %v114_v26  ;;  %v277_v51 = vadd.f32 %v1013_v45, %v94_v49  ;;  %v874_v45 = vld [vmem:[#allocation5 + $0x70] sm:$0xff]  }
  0xf8   :  { %v785_v52 = vpop.f32.mrf.mxu0 }
  0xf9   :  { %v304_v23 = vadd.f32 %v785_v52, %v129_v11  ;;  %v343_v40 = vmax.f32 %v293_v34, 0.0 }
  0xfa   :  { %v295_v54 = vpop.f32.mrf.mxu0 }
  0xfb   :  { %v346_v29 = vmax.f32 %v304_v23, 0.0  ;;  %v296_v30 = vadd.f32 %v295_v54, %v119_v22 }
  0xfc   :  { %v788_v56 = vpop.f32.mrf.mxu0 }
  0xfd   :  { %v317_v12 = vadd.f32 %v788_v56, %v144_v60  ;;  %v358_v37 = vpack.c.bf16 %v346_v29, %v345_v33  ;;  %v344_v38 = vmax.f32 %v296_v30, 0.0  ;;  %v872_v56 = vld [vmem:[#allocation5 + $0x60] sm:$0xff]  }
  0xfe   :  { %v308_v57 = vpop.f32.mrf.mxu0 }
  0xff   :  { %v349_v20 = vmax.f32 %v317_v12, 0.0  ;;  %v309_v21 = vadd.f32 %v308_v57, %v134_v2  ;;  %v873_v57 = vld [vmem:[#allocation5 + $0x68] sm:$0xff]  }
 0x100   :  { %v789_v59 = vpop.f32.mrf.mxu0 }
 0x101   :  { %v320_v7 = vadd.f32 %v789_v59, %v149_v58  ;;  %v347_v28 = vmax.f32 %v309_v21, 0.0  ;;  %v875_v58 = vld [vmem:[#allocation5 + $0x78] sm:$0xff]   ;;  %v971_v59 = vmov 0.0  }
 0x102   :  { %v311_v61 = vpop.f32.mrf.mxu0  ;;  %826 = vmatprep.subr.bf16.mxu0 %v971_v59  ;;  %842 = vmatprep.mubr.msk.bf16.mxu0 %vm972_vm1, %v971_v59 }
 0x103   :  { %v350_v17 = vmax.f32 %v320_v7, 0.0  ;;  %v312_v18 = vadd.f32 %v311_v61, %v139_v63 }
 0x104   :  { %v792_v62 = vpop.f32.mrf.mxu0 }
 0x105   :  { %v333_v1 = vadd.f32 %v792_v62, %v164_v50  ;;  %v360_v24 = vpack.c.bf16 %v350_v17, %v349_v20  ;;  %v348_v25 = vmax.f32 %v312_v18, 0.0  ;;  %v341_v50 = vmax.f32 %v285_v39, 0.0 }
 0x106   :  { %v324_v0 = vpop.f32.mrf.mxu0 }
 0x107   :  { %v325_v4 = vadd.f32 %v324_v0, %v154_v48  ;;  %v353_v8 = vmax.f32 %v333_v1, 0.0  ;;  %v359_v31 = vpack.c.bf16 %v348_v25, %v347_v28  ;;  %v357_v48 = vpack.c.bf16 %v344_v38, %v343_v40  ;;  %v473_v1 = vpop.permute.xlu1 %472 }
 0x108   :  { %v793_v3 = vpop.f32.mrf.mxu0  ;;  %v356_v52 = vpack.c.bf16 %v342_v42, %v341_v50 }
 0x109   :  { %v336_v5 = vadd.f32 %v793_v3, %v169_v55  ;;  %v351_v13 = vmax.f32 %v325_v4, 0.0  ;;  %v870_v55 = vld [vmem:[#allocation5 + $0x50] sm:$0xff]   ;;  %v468_v3 = vpop.permute.xlu0 %467 }
 0x10a   :  { %v327_v6 = vpop.f32.mrf.mxu0 }
 0x10b   :  { %v354_v9 = vmax.f32 %v336_v5, 0.0  ;;  %v328_v10 = vadd.f32 %v327_v6, %v159_v53  ;;  %v339_v53 = vmax.f32 %v277_v51, 0.0  ;;  %v463_v6 = vpop.permute.xlu1 %462 }
 0x10d   :  { %v352_v14 = vmax.f32 %v328_v10, 0.0  ;;  %v362_v15 = vpack.c.bf16 %v354_v9, %v353_v8  ;;  %v355_v54 = vpack.c.bf16 %v340_v46, %v339_v53  ;;  %v458_v8 = vpop.permute.xlu0 %457 }
 0x10f   :  { %v361_v19 = vpack.c.bf16 %v352_v14, %v351_v13  ;;  %794 = vmatprep.subr.bf16.mxu1 %v362_v15  ;;  %v453_v11 = vpop.permute.xlu1 %452 }
 0x110   :  { %795 = vmatpush3.bf16.msra.mxu1 %v362_v15 }
 0x111   :  { %796 = vmatprep.subr.bf16.mxu1 %v361_v19  ;;  %v448_v13 = vpop.permute.xlu0 %447 }
 0x113   :  { %v443_v17 = vpop.permute.xlu1 %442 }
 0x114   :  { %797 = vmatpush3.bf16.msra.mxu1 %v361_v19 }
 0x115   :  { %798 = vmatprep.subr.bf16.mxu1 %v360_v24  ;;  %v438_v20 = vpop.permute.xlu0 %437 }
 0x117   :  { %v433_v29 = vpop.permute.xlu1 %432 }
 0x118   :  { %799 = vmatpush3.bf16.msra.mxu1 %v360_v24 }
 0x119   :  { %800 = vmatprep.subr.bf16.mxu1 %v359_v31  ;;  %v428_v32 = vpop.permute.xlu0 %427 }
 0x11b   :  { %v423_v38 = vpop.permute.xlu1 %422 }
 0x11c   :  { %801 = vmatpush3.bf16.msra.mxu1 %v359_v31 }
 0x11d   :  { %802 = vmatprep.subr.bf16.mxu1 %v358_v37  ;;  %v418_v42 = vpop.permute.xlu0 %417 }
 0x120   :  { %803 = vmatpush3.bf16.msra.mxu1 %v358_v37 }
 0x121   :  { %804 = vmatprep.subr.bf16.mxu1 %v357_v48 }
 0x124   :  { %805 = vmatpush3.bf16.msra.mxu1 %v357_v48 }
 0x125   :  { %806 = vmatprep.subr.bf16.mxu1 %v356_v52 }
 0x128   :  { %807 = vmatpush3.bf16.msra.mxu1 %v356_v52  ;;  %v413_v52 = vpop.permute.xlu1 %412 }
 0x129   :  { %808 = vmatprep.subr.bf16.mxu1 %v355_v54 }
 0x12c   :  { %809 = vmatpush3.bf16.msra.mxu1 %v355_v54  ;;  %v408_v54 = vpop.permute.xlu0 %407 }
 0x12f   :  { %811 = vmatmul.mubr.bf16.vlgmr.msra.gmra.mxu1 %v869_v44 }
 0x130   :  { %814 = vmatprep.mubr.bf16.mxu1 %v870_v55 }
 0x137   :  { %815 = vmatmul.mubr.bf16.gmra.mxu1 %v871_v47 }
 0x138   :  { %818 = vmatprep.mubr.bf16.mxu1 %v872_v56 }
 0x13f   :  { %819 = vmatmul.mubr.bf16.gmra.mxu1 %v873_v57 }
 0x140   :  { %822 = vmatprep.mubr.bf16.mxu1 %v874_v45  ;;  %v403_v45 = vpop.permute.xlu1 %402 }
 0x147   :  { %823 = vmatmul.mubr.bf16.gmra.mxu1 %v875_v58 }
 0x1ef   :  { %v1022_v60 = vpop.f32.mrf.mxu1 }
 0x1f0   :  { %v566_v56 = vadd.f32 %v1022_v60, %v408_v54 }
 0x1f1   :  { %v1024_v61 = vpop.f32.mrf.mxu1 }
 0x1f3   :  { %v813_v62 = vpop.f32.mrf.mxu1 }
 0x1f4   :  { %v569_v44 = vadd.f32 %v813_v62, %v413_v52 }
 0x1f5   :  { %v1026_v63 = vpop.f32.mrf.mxu1 }
 0x1f6   :  { %v623_v58 = vmax.f32 %v569_v44, 0.0 }
 0x1f7   :  { %v816_v0 = vpop.f32.mrf.mxu1 }
 0x1f8   :  { %v582_v43 = vadd.f32 %v816_v0, %v428_v32  ;;  %v561_v0 = vadd.f32 %v1026_v63, %v403_v45 }
 0x1f9   :  { %v573_v2 = vpop.f32.mrf.mxu1 }
 0x1fa   :  { %v626_v46 = vmax.f32 %v582_v43, 0.0  ;;  %v574_v53 = vadd.f32 %v573_v2, %v418_v42  ;;  %v622_v2 = vmax.f32 %v566_v56, 0.0 }
 0x1fb   :  { %v817_v4 = vpop.f32.mrf.mxu1 }
 0x1fc   :  { %v585_v39 = vadd.f32 %v817_v4, %v433_v29  ;;  %v624_v57 = vmax.f32 %v574_v53, 0.0  ;;  %v637_v62 = vpack.c.bf16 %v623_v58, %v622_v2 }
 0x1fd   :  { %v576_v5 = vpop.f32.mrf.mxu1 }
 0x1fe   :  { %v627_v49 = vmax.f32 %v585_v39, 0.0  ;;  %v577_v50 = vadd.f32 %v576_v5, %v423_v38  ;;  %v621_v5 = vmax.f32 %v561_v0, 0.0 }
 0x1ff   :  { %v820_v7 = vpop.f32.mrf.mxu1 }
 0x200   :  { %v598_v30 = vadd.f32 %v820_v7, %v448_v13  ;;  %v639_v55 = vpack.c.bf16 %v627_v49, %v626_v46  ;;  %v625_v47 = vmax.f32 %v577_v50, 0.0  ;;  %v876_v7 = vld [vmem:[#allocation5 + $0x80] sm:$0xff]  }
 0x201   :  { %v589_v9 = vpop.f32.mrf.mxu1 }
 0x202   :  { %v630_v36 = vmax.f32 %v598_v30, 0.0  ;;  %v590_v37 = vadd.f32 %v589_v9, %v438_v20 }
 0x203   :  { %v821_v10 = vpop.f32.mrf.mxu1 }
 0x204   :  { %v601_v26 = vadd.f32 %v821_v10, %v453_v11  ;;  %v628_v48 = vmax.f32 %v590_v37, 0.0 }
 0x205   :  { %v592_v12 = vpop.f32.mrf.mxu1 }
 0x206   :  { %v631_v33 = vmax.f32 %v601_v26, 0.0  ;;  %v593_v34 = vadd.f32 %v592_v12, %v443_v17 }
 0x207   :  { %v824_v14 = vpop.f32.mrf.mxu1 }
 0x208   :  { %v614_v16 = vadd.f32 %v824_v14, %v468_v3  ;;  %v641_v40 = vpack.c.bf16 %v631_v33, %v630_v36  ;;  %v629_v41 = vmax.f32 %v593_v34, 0.0  ;;  %v398_v3 = vpop.permute.xlu0 %397 }
 0x209   :  { %v605_v15 = vpop.f32.mrf.mxu1  ;;  %v558_v4 = vadd.f32 %v1024_v61, %v398_v3 }
 0x20a   :  { %v634_v22 = vmax.f32 %v614_v16, 0.0  ;;  %v606_v23 = vadd.f32 %v605_v15, %v458_v8  ;;  %v640_v51 = vpack.c.bf16 %v629_v41, %v628_v48 }
 0x20b   :  { %v825_v18 = vpop.f32.mrf.mxu1 }
 0x20c   :  { %v617_v19 = vadd.f32 %v825_v18, %v473_v1  ;;  %v632_v31 = vmax.f32 %v606_v23, 0.0  ;;  %v638_v1 = vpack.c.bf16 %v625_v47, %v624_v57  ;;  %v696_v63 = vpop.permute.xlu0 %695 }
 0x20d   :  { %v608_v21 = vpop.f32.mrf.mxu1 }
 0x20e   :  { %v635_v24 = vmax.f32 %v617_v19, 0.0  ;;  %v609_v25 = vadd.f32 %v608_v21, %v463_v6  ;;  %v620_v6 = vmax.f32 %v558_v4, 0.0 }
 0x210   :  { %v643_v27 = vpack.c.bf16 %v635_v24, %v634_v22  ;;  %v633_v28 = vmax.f32 %v609_v25, 0.0  ;;  %v636_v60 = vpack.c.bf16 %v621_v5, %v620_v6 }
 0x212   :  { %827 = vmatpush3.bf16.msra.mxu0 %v643_v27  ;;  %v642_v35 = vpack.c.bf16 %v633_v28, %v632_v31 }
 0x213   :  { %828 = vmatprep.subr.bf16.mxu0 %v971_v59 }
 0x216   :  { %829 = vmatpush3.bf16.msra.mxu0 %v642_v35 }
 0x217   :  { %830 = vmatprep.subr.bf16.mxu0 %v971_v59 }
 0x21a   :  { %831 = vmatpush3.bf16.msra.mxu0 %v641_v40 }
 0x21b   :  { %832 = vmatprep.subr.bf16.mxu0 %v971_v59 }
 0x21e   :  { %833 = vmatpush3.bf16.msra.mxu0 %v640_v51 }
 0x21f   :  { %834 = vmatprep.subr.bf16.mxu0 %v971_v59 }
 0x222   :  { %835 = vmatpush3.bf16.msra.mxu0 %v639_v55 }
 0x223   :  { %836 = vmatprep.subr.bf16.mxu0 %v971_v59 }
 0x226   :  { %837 = vmatpush3.bf16.msra.mxu0 %v638_v1 }
 0x227   :  { %838 = vmatprep.subr.bf16.mxu0 %v971_v59 }
 0x22a   :  { %839 = vmatpush3.bf16.msra.mxu0 %v637_v62 }
 0x22b   :  { %840 = vmatprep.subr.bf16.mxu0 %v971_v59 }
 0x22e   :  { %841 = vmatpush3.bf16.msra.mxu0 %v636_v60 }
 0x231   :  { %843 = vmatmul.mubr.bf16.vlgmr.msra.gmra.mxu0 %v876_v7 }
 0x2f1   :  { %v687_v8 = vpop.f32.mrf.mxu0 }
 0x2f2   :  { %v698_v9 = vadd.f32 %v696_v63, %v687_v8 }
 0x2f3   :  { %v844_v61 = vpop.f32.mrf.mxu0 }
 0x2f4   :  { %699 = vst [vmem:[#allocation8] sm:$0x1] %v698_v9 }
 0x2f5   :  { %v690_v10 = vpop.f32.mrf.mxu0 }
 0x2f6   :  { %948 = shalt.err (!%p945_p5)
}
 0x2f7   :  { %709 = dma.vmem_to_hbm [thread:$0]  %s707_s2, 16, %s1044_s3, [#allocation4]   ;;  %v845_v59 = vpop.f32.mrf.mxu0 }
 0x2f8   :  { %961 = dma.done.wait [#allocation4], 16  }
 0x2f9   :  { %962 = vsyncadd [#allocation4], 4294967280 }
 0x2fa   :  { %713 = vsyncpa [#allocation3], 1 }
 0x2fb   :  { %714 = vsyncpa [#allocation6], 1 }
 0x2fc   :  { %715 = vsyncpa [#allocation4], 1 }

</bundles_post_ra>
